<compile_context>
chip_gen: v7x
topology: tpu7x:2x2x1
jax: 0.10.0
libtpu: 0.0.40
codegen_flags: <defaults>
</compile_context>

<pallas_src>
import math
import numpy as np
import jax
import jax.numpy as jnp
from jax.experimental import pallas as pl
from jax.experimental.pallas import tpu as pltpu

HIDDEN_DIM = 32  # cmd_args.hidden_dim


def _dot(a, b):
    return jnp.dot(a, b, preferred_element_type=jnp.float32)


def _pack_rows(blocks, lane_width):
    """Pack named 2-D arrays into one f32 slab; every block starts on an 8-aligned row."""
    offs, rows = {}, 0
    for name, a in blocks:
        assert a.ndim == 2 and a.shape[1] <= lane_width, (name, a.shape, lane_width)
        offs[name] = rows
        rows += ((a.shape[0] + 7) // 8) * 8
    slab = jnp.zeros((max(8, rows), lane_width), jnp.float32)
    for name, a in blocks:
        slab = slab.at[offs[name]:offs[name] + a.shape[0], :a.shape[1]].set(
            jnp.asarray(a, jnp.float32))
    return slab, offs


# -----------------------------------------------------------------------------
# Build a jitted, batched forward closed over the packed params + graph structure.
# -----------------------------------------------------------------------------
def make_node_decoder(heads, gru, graph, num_nodes=None, hidden_dim=HIDDEN_DIM):
    H, HH = hidden_dim, hidden_dim // 2
    H2, H3, H4, HH3 = 2 * H, 3 * H, 4 * H, 3 * HH
    var_locs = list(graph["var_locs"])
    aor_locs = list(graph["attr_or_rela_locs"])
    node_names, attrs = graph["node_names"], graph["attrs"]
    if num_nodes is None:
        num_nodes = len(node_names)
    # rela order == aor order with attrs filtered out; EP / GM below must use this
    # same order (rela_pos) or rela_states rows would be routed to the wrong pairs.
    rela_locs = [l for l in aor_locs if node_names[l] not in attrs]
    rela_pos = {l: p for p, l in enumerate(rela_locs)}
    V, A, R = len(var_locs), len(aor_locs), len(rela_locs)
    VR = V + R
    NPAIR = V * A + R * V            # (var1, attr_or_rela) pairs + (rela, var2) pairs
    NS = V + NPAIR                   # total score rows fed to the shared head tail
    NSTACK = A + 2 * V + R           # rows of the pair-expansion stack
    n_actions = V * ((A - R) + R * (V - 1))
    NPAD = ((max(n_actions, 1) + 127) // 128) * 128   # lane-dense output width

    # ---- packed weight slab (one DMA, VMEM-resident across the whole grid) -------
    hv1, hao, hv2 = heads["var1"], heads["attr_or_rela"], heads["var2"]
    gwi = jnp.concatenate([gru["wi"][g] for g in range(3)], axis=1)   # (H, 3H) [r|z|n]
    gwh = jnp.concatenate([gru["wh"][g] for g in range(3)], axis=1)   # (H, 3H)
    gbi = jnp.concatenate([gru["bi"][g] for g in range(3)], axis=1)   # (1, 3H)
    gbh = jnp.concatenate([gru["bh"][g] for g in range(3)], axis=1)   # (1, 3H)
    zHH = jnp.zeros((1, HH), jnp.float32)
    w3sel = jnp.concatenate([                                         # (NS, 3*H/2)
        jnp.tile(jnp.concatenate([hv1["w3"].T, zHH, zHH], axis=1), (V, 1)),
        jnp.tile(jnp.concatenate([zHH, hao["w3"].T, zHH], axis=1), (V * A, 1)),
        jnp.tile(jnp.concatenate([zHH, zHH, hv2["w3"].T], axis=1), (R * V, 1))], axis=0)
    b1p = jnp.concatenate([jnp.tile(hao["b1"], (V * A, 1)),           # (NPAIR, H) per-row b1
                           jnp.tile(hv2["b1"], (R * V, 1))], axis=0)
    wpk, wo = _pack_rows([
        ("wst", jnp.concatenate([gwh, hv1["w1"][H:]], axis=1)),             # (H, 4H)
        ("wgi", gwi),                                                        # (H, 3H)
        ("wvar", jnp.concatenate([hv1["w1"][:H], hv2["w1"][:H]], axis=1)),   # (H, 2H)
        ("wsta", jnp.concatenate([hao["w1"][H:], hv2["w1"][H:]], axis=1)),   # (H, 2H)
        ("waor", hao["w1"][:H]),                                             # (H, H)
        ("w2", jnp.concatenate([hv1["w2"], hao["w2"], hv2["w2"]], axis=1)),  # (H, 3H/2)
        ("gbh", gbh), ("gbi", gbi), ("b1v1", hv1["b1"]),
        ("b2", jnp.concatenate([hv1["b2"], hao["b2"], hv2["b2"]], axis=1)),
        ("b1p", b1p), ("w3sel", w3sel),
    ], H4)

    # ---- packed constants slab: row selection, pair expansion, action gather -----
    SEL = np.zeros((VR + A, num_nodes), np.float32)      # row order: [var | rela | aor]
    for i, l in enumerate(var_locs):
        SEL[i, l] = 1.0
    for r, l in enumerate(rela_locs):
        SEL[V + r, l] = 1.0
    for a, l in enumerate(aor_locs):
        SEL[VR + a, l] = 1.0

    # pair expansion: stack rows = [loc_a (A) | st_a (V) | loc_v2 (V) | st_v (R)]
    EP = np.zeros((NPAIR, NSTACK), np.float32)
    for i in range(V):
        for a in range(A):
            EP[i * A + a, a] = 1.0
            EP[i * A + a, A + i] = 1.0
    for r in range(R):
        for v2 in range(V):
            EP[V * A + r * V + v2, A + V + v2] = 1.0
            EP[V * A + r * V + v2, A + 2 * V + r] = 1.0

    # score-row -> action-lane gather in deterministic nested (var1, attr_or_rela, var2)
    # order.  TODO(synk): the torch module scatters via state.action_dict[str(...)]; that
    # pure-Python bookkeeping only permutes action lanes and stays host-side.
    GM = np.zeros((NS, NPAD), np.float32)
    valid = np.zeros((NPAD,), np.float32)
    is_rela = np.zeros((NPAD,), np.float32)
    j = 0
    for i in range(V):
        for a, a_loc in enumerate(aor_locs):
            if node_names[a_loc] in attrs:
                GM[i, j] = 1.0
                GM[V + i * A + a, j] = 1.0
                valid[j] = 1.0
                j += 1
            else:
                r = rela_pos[a_loc]
                for v2 in range(V):
                    if var_locs[v2] == var_locs[i]:
                        continue   # var2 != var1: the (rela, v2 == var1) score rows are
                                   # still computed but intentionally never gathered.
                    GM[i, j] = 1.0
                    GM[V + i * A + a, j] = 1.0
                    GM[V + V * A + r * V + v2, j] = 1.0
                    valid[j] = 1.0
                    is_rela[j] = 1.0
                    j += 1
    assert j == n_actions

    # b3 of every head folded into one precomputed output-bias row
    out_bias = (jnp.asarray(valid)[None, :] * (hv1["b3"][0, 0] + hao["b3"][0, 0])
                + jnp.asarray(is_rela)[None, :] * hv2["b3"][0, 0])       # (1, NPAD)

    cpk, co = _pack_rows(
        [("sel", SEL), ("ep", EP), ("gm", GM), ("ob", out_bias)],
        max(128, NPAD, num_nodes, NSTACK))

    # ---- the fused kernel (one batch element per grid point) ---------------------
    def node_decoder_kernel(emb_ref, st_ref, w_ref, c_ref, out_ref):
        emb = emb_ref[0]                                    # (num_nodes, H)
        state = st_ref[0]                                   # (1, H)  self.state

        # select [var | rela | aor] rows with one constant one-hot matmul
        sel = c_ref[co["sel"]:co["sel"] + VR + A, :num_nodes]
        x_all = _dot(sel, emb)                              # (V+R+A, H)
        var_loc = x_all[:V]
        aor_loc = x_all[VR:VR + A]

        # state-side projections merged along N: [gwh_r | gwh_z | gwh_n | w1b_var1]
        stp = _dot(state, w_ref[wo["wst"]:wo["wst"] + H, :H4])             # (1, 4H)
        gh = stp[:, :H3] + w_ref[wo["gbh"]:wo["gbh"] + 1, :H3]             # (1, 3H)
        st_v1 = stp[:, H3:H4]                                              # (1, H)

        # GRUCell(hidden = self.state) on stacked [var; rela] rows, gates fused on N
        gi = (_dot(x_all[:VR], w_ref[wo["wgi"]:wo["wgi"] + H, :H3])
              + w_ref[wo["gbi"]:wo["gbi"] + 1, :H3])                       # (V+R, 3H)
        r = jax.nn.sigmoid(gi[:, :H] + gh[:, :H])
        z = jax.nn.sigmoid(gi[:, H:H2] + gh[:, H:H2])
        n = jnp.tanh(gi[:, H2:H3] + r * gh[:, H2:H3])
        states_all = (1.0 - z) * n + z * state                             # (V+R, H)

        # head input projections, shared-input matmuls merged along N
        var_proj = _dot(var_loc, w_ref[wo["wvar"]:wo["wvar"] + H, :H2])    # (V, 2H) [v1|v2]
        loc_a = _dot(aor_loc, w_ref[wo["waor"]:wo["waor"] + H, :H])        # (A, H)
        sts = _dot(states_all, w_ref[wo["wsta"]:wo["wsta"] + H, :H2])      # (V+R, 2H) [aor|v2]

        # var1 head: concat(local_var, self.state) @ W1 + b1
        h1_v1 = var_proj[:, :H] + st_v1 + w_ref[wo["b1v1"]:wo["b1v1"] + 1, :H]   # (V, H)

        # all (var1, aor) and (rela, var2) pair pre-activations via ONE expansion matmul
        stack = jnp.concatenate(
            [loc_a,                 # attr_or_rela local term                 (A, H)
             sts[:V, :H],           # var1 current_state term (aor head)      (V, H)
             var_proj[:, H:H2],     # var2 local term                         (V, H)
             sts[V:, H:H2]],        # prob_or_rela_state term (var2 head)     (R, H)
            axis=0)                                                          # (NSTACK, H)
        ep = c_ref[co["ep"]:co["ep"] + NPAIR, :NSTACK]
        h1_pair = _dot(ep, stack) + w_ref[wo["b1p"]:wo["b1p"] + NPAIR, :H]   # (NPAIR, H)

        # shared tail: ReLU -> one wide Linear(H, 3*H/2) -> ReLU -> masked-w3 lane reduce
        h1 = jnp.maximum(jnp.concatenate([h1_v1, h1_pair], axis=0), 0.0)     # (NS, H)
        h2 = jnp.maximum(_dot(h1, w_ref[wo["w2"]:wo["w2"] + H, :HH3])
                         + w_ref[wo["b2"]:wo["b2"] + 1, :HH3], 0.0)          # (NS, 3H/2)
        w3m = w_ref[wo["w3sel"]:wo["w3sel"] + NS, :HH3]
        scores = jnp.sum(h2 * w3m, axis=-1, keepdims=True)                   # (NS, 1)

        # action assembly: one broadcast-mul + one sublane reduce, lane-dense store
        gm = c_ref[co["gm"]:co["gm"] + NS, :NPAD]
        ob = c_ref[co["ob"]:co["ob"] + 1, :NPAD]
        out_ref[0] = jnp.sum(scores * gm, axis=0, keepdims=True) + ob

    w_shape, c_shape = tuple(wpk.shape), tuple(cpk.shape)

    @jax.jit
    def forward_batched(local_embeddings, global_embedding):
        """(B, num_nodes, H), (B, 1, H) -> (B, n_actions)."""
        B = local_embeddings.shape[0]
        out = pl.pallas_call(
            node_decoder_kernel,
            out_shape=jax.ShapeDtypeStruct((B, 1, NPAD), jnp.float32),
            grid=(B,),
            in_specs=[
                pl.BlockSpec((1, num_nodes, H), lambda b: (b, 0, 0)),
                pl.BlockSpec((1, 1, H), lambda b: (b, 0, 0)),
                pl.BlockSpec(w_shape, lambda b: (0, 0)),    # weights: fetched once, resident
                pl.BlockSpec(c_shape, lambda b: (0, 0)),    # constants: fetched once, resident
            ],
            out_specs=pl.BlockSpec((1, 1, NPAD), lambda b: (b, 0, 0)),
            compiler_params=pltpu.CompilerParams(
                dimension_semantics=("parallel",)),         # batch axis -> both v7x TCs
        )(local_embeddings, global_embedding, wpk, cpk)
        return out[:, 0, :n_actions]

    def forward(local_embeddings, global_embedding):
        """Single-graph call matching the torch module: (num_nodes,H),(1,H) -> (1, n_actions)."""
        return forward_batched(local_embeddings[None], global_embedding[None])[0:1]

    return forward, forward_batched


# -----------------------------------------------------------------------------
# Deterministic parameter init (shapes from the module's __init__)
# -----------------------------------------------------------------------------
def init_linear(key, fan_in, fan_out):
    k1, k2 = jax.random.split(key)
    bound = 1.0 / math.sqrt(fan_in)
    w = jax.random.uniform(k1, (fan_in, fan_out), jnp.float32, -bound, bound)
    b = jax.random.uniform(k2, (1, fan_out), jnp.float32, -bound, bound)
    return w, b


def init_score_head(key, H):
    k1, k2, k3 = jax.random.split(key, 3)
    w1, b1 = init_linear(k1, 2 * H, H)          # Linear(2H, H)
    w2, b2 = init_linear(k2, H, H // 2)         # Linear(H, H/2)
    w3, b3 = init_linear(k3, H // 2, 1)         # Linear(H/2, 1)
    return dict(w1=w1, b1=b1, w2=w2, b2=b2, w3=w3, b3=b3)


def init_gru(key, H):
    kw = jax.random.split(key, 4)
    bound = 1.0 / math.sqrt(H)
    return dict(  # gate order [r, z, n], weights pre-transposed so x @ w[g]
        wi=jax.random.uniform(kw[0], (3, H, H), jnp.float32, -bound, bound),
        wh=jax.random.uniform(kw[1], (3, H, H), jnp.float32, -bound, bound),
        bi=jax.random.uniform(kw[2], (3, 1, H), jnp.float32, -bound, bound),
        bh=jax.random.uniform(kw[3], (3, 1, H), jnp.float32, -bound, bound),
    )


# -----------------------------------------------------------------------------
# Pure-JAX reference mirroring the PyTorch loop structure (validation only)
# -----------------------------------------------------------------------------
def reference_forward(local_embeddings, global_embedding, heads, gru, graph, H=HIDDEN_DIM):
    state = global_embedding
    var_locs = list(graph["var_locs"])
    aor_locs = list(graph["attr_or_rela_locs"])
    node_names, attrs = graph["node_names"], graph["attrs"]

    def score(head, x_local, st):
        x = jnp.concatenate([x_local, jnp.broadcast_to(st, x_local.shape)], axis=1)
        h = jnp.maximum(x @ head["w1"] + head["b1"], 0.0)
        h = jnp.maximum(h @ head["w2"] + head["b2"], 0.0)
        return h @ head["w3"] + head["b3"]

    def gru_cell(x, h):
        r = jax.nn.sigmoid(x @ gru["wi"][0] + gru["bi"][0] + h @ gru["wh"][0] + gru["bh"][0])
        z = jax.nn.sigmoid(x @ gru["wi"][1] + gru["bi"][1] + h @ gru["wh"][1] + gru["bh"][1])
        n = jnp.tanh(x @ gru["wi"][2] + gru["bi"][2] + r * (h @ gru["wh"][2] + gru["bh"][2]))
        return (1.0 - z) * n + z * h

    var_local = local_embeddings[jnp.asarray(var_locs)]
    aor_local = local_embeddings[jnp.asarray(aor_locs)]
    var1_probs = score(heads["var1"], var_local, state)
    var1_states = gru_cell(var_local, state)
    aor_states = gru_cell(aor_local, state)        # hidden is always self.state, as in torch

    values = []
    for i, v1_loc in enumerate(var_locs):
        cur = var1_states[i:i + 1]
        aor_probs = score(heads["attr_or_rela"], aor_local, cur)
        for a, a_loc in enumerate(aor_locs):
            if node_names[a_loc] in attrs:
                values.append(var1_probs[i, 0] + aor_probs[a, 0])
            else:
                st_r = aor_states[a:a + 1]
                v2_locs = [v for v in var_locs if v != v1_loc]
                v2_probs = score(heads["var2"], local_embeddings[jnp.asarray(v2_locs)], st_r)
                for p in range(len(v2_locs)):
                    values.append(var1_probs[i, 0] + aor_probs[a, 0] + v2_probs[p, 0])
    return jnp.stack(values).reshape(1, -1)


# -----------------------------------------------------------------------------
if __name__ == "__main__":
    H = HIDDEN_DIM
    NUM_NODES = 8
    BATCH = 4

    key = jax.random.PRNGKey(0)
    k_loc, k_glob, k_v1, k_v2, k_attr, k_rela, k_aor, k_gru = jax.random.split(key, 8)

    # B decoder invocations batched into one pallas_call (timesteps / envs / beams)
    local_embeddings = jax.random.normal(k_loc, (BATCH, NUM_NODES, H), jnp.float32)
    global_embedding = jax.random.normal(k_glob, (BATCH, 1, H), jnp.float32)

    heads = {
        "var1": init_score_head(k_v1, H),
        "var2": init_score_head(k_v2, H),
        "attr": init_score_head(k_attr, H),       # defined in __init__, unused in forward
        "rela": init_score_head(k_rela, H),       # defined in __init__, unused in forward
        "attr_or_rela": init_score_head(k_aor, H),
    }
    gru = init_gru(k_gru, H)

    # Synthetic graph: 3 variable nodes, 2 attribute nodes, 2 relation nodes.
    graph = {
        "var_locs": [0, 1, 2],
        "attr_or_rela_locs": [3, 4, 5, 6],
        "node_names": {0: "v1", 1: "v2", 2: "v3", 3: "a0", 4: "a1", 5: "r0", 6: "r1"},
        "attrs": {"a0", "a1"},
    }

    forward, forward_batched = make_node_decoder(heads, gru, graph,
                                                 num_nodes=NUM_NODES, hidden_dim=H)
    out = jax.block_until_ready(forward_batched(local_embeddings, global_embedding))

    # num actions = num_vars * (num_attrs + num_relas * (num_vars - 1)) = 3*(2+2*2) = 18
    assert out.shape == (BATCH, 18), out.shape
    assert bool(jnp.all(jnp.isfinite(out)))

    with jax.default_matmul_precision("highest"):
        ref = jnp.concatenate(
            [reference_forward(local_embeddings[b], global_embedding[b], heads, gru, graph, H)
             for b in range(BATCH)], axis=0)
        ref = jax.block_until_ready(ref)
    # Both sides are f32 (reference at HIGHEST matmul precision); 2e-3 leaves margin for
    # MXU f32 pass decomposition + EUP sigmoid/tanh approximations while still catching
    # any real wiring bug (those show up as O(0.1) errors).
    assert jnp.allclose(out, ref, atol=2e-3, rtol=2e-3), float(jnp.max(jnp.abs(out - ref)))
    print("KERNEL_OK")
</pallas_src>

<mosaic_0001>
module attributes {stable_mosaic.version = 11 : i64} {
  func.func @node_decoder_kernel(%arg0: i32, %arg1: memref<1x8x32xf32, #tpu.memory_space<vmem>>, %arg2: memref<1x1x32xf32, #tpu.memory_space<vmem>>, %arg3: memref<272x128xf32, #tpu.memory_space<vmem>>, %arg4: memref<72x128xf32, #tpu.memory_space<vmem>>, %arg5: memref<1x1x128xf32, #tpu.memory_space<vmem>>) attributes {dimension_semantics = [#tpu.dimension_semantics<parallel>], iteration_bounds = array<i64: 4>, scalar_prefetch = 0 : i64, scratch_operands = 0 : i64, tpu.core_type = #tpu.core_type<tc>, window_params = [{transform_indices = @transform_0, window_bounds = array<i64: 1, 8, 32>}, {transform_indices = @transform_1, window_bounds = array<i64: 1, 1, 32>}, {pipeline_mode = #tpu.pipeline_mode<synchronous>, transform_indices = @transform_2, window_bounds = array<i64: 272, 128>}, {pipeline_mode = #tpu.pipeline_mode<synchronous>, transform_indices = @transform_3, window_bounds = array<i64: 72, 128>}, {transform_indices = @transform_4, window_bounds = array<i64: 1, 1, 128>}]} {
    %c0 = arith.constant 0 : index
    %c0_0 = arith.constant 0 : index
    %c0_1 = arith.constant 0 : index
    %0 = vector.load %arg1[%c0, %c0_0, %c0_1] : memref<1x8x32xf32, #tpu.memory_space<vmem>>, vector<1x8x32xf32>
    %1 = vector.shape_cast %0 : vector<1x8x32xf32> to vector<8x32xf32>
    %c0_2 = arith.constant 0 : index
    %c0_3 = arith.constant 0 : index
    %c0_4 = arith.constant 0 : index
    %2 = vector.load %arg2[%c0_2, %c0_3, %c0_4] : memref<1x1x32xf32, #tpu.memory_space<vmem>>, vector<1x1x32xf32>
    %3 = vector.shape_cast %2 : vector<1x1x32xf32> to vector<1x32xf32>
    %c0_5 = arith.constant 0 : index
    %c0_6 = arith.constant 0 : index
    %4 = vector.load %arg4[%c0_5, %c0_6] : memref<72x128xf32, #tpu.memory_space<vmem>>, vector<9x8xf32>
    %cst = arith.constant dense<0.000000e+00> : vector<9x32xf32>
    %5 = tpu.matmul %4, %1, %cst {dimension_numbers = #tpu.dot_dimension_numbers<[1], [0], [0], [1], [0, 0, 1, 1], [], []>} : vector<9x8xf32>, vector<8x32xf32>, vector<9x32xf32> -> vector<9x32xf32>
    %6 = vector.extract_strided_slice %5 {offsets = [0, 0], sizes = [3, 32], strides = [1, 1]} : vector<9x32xf32> to vector<3x32xf32>
    %7 = vector.extract_strided_slice %5 {offsets = [5, 0], sizes = [4, 32], strides = [1, 1]} : vector<9x32xf32> to vector<4x32xf32>
    %c0_7 = arith.constant 0 : index
    %c0_8 = arith.constant 0 : index
    %8 = vector.load %arg3[%c0_7, %c0_8] : memref<272x128xf32, #tpu.memory_space<vmem>>, vector<32x128xf32>
    %cst_9 = arith.constant dense<0.000000e+00> : vector<1x128xf32>
    %9 = tpu.matmul %3, %8, %cst_9 {dimension_numbers = #tpu.dot_dimension_numbers<[1], [0], [0], [1], [0, 0, 1, 1], [], []>} : vector<1x32xf32>, vector<32x128xf32>, vector<1x128xf32> -> vector<1x128xf32>
    %10 = vector.extract_strided_slice %9 {offsets = [0, 0], sizes = [1, 96], strides = [1, 1]} : vector<1x128xf32> to vector<1x96xf32>
    %c192 = arith.constant 192 : index
    %c0_10 = arith.constant 0 : index
    %11 = vector.load %arg3[%c192, %c0_10] : memref<272x128xf32, #tpu.memory_space<vmem>>, vector<1x96xf32>
    %12 = arith.addf %10, %11 : vector<1x96xf32>
    %13 = vector.extract_strided_slice %9 {offsets = [0, 96], sizes = [1, 32], strides = [1, 1]} : vector<1x128xf32> to vector<1x32xf32>
    %14 = vector.extract_strided_slice %5 {offsets = [0, 0], sizes = [5, 32], strides = [1, 1]} : vector<9x32xf32> to vector<5x32xf32>
    %c32 = arith.constant 32 : index
    %c0_11 = arith.constant 0 : index
    %15 = vector.load %arg3[%c32, %c0_11] : memref<272x128xf32, #tpu.memory_space<vmem>>, vector<32x96xf32>
    %cst_12 = arith.constant dense<0.000000e+00> : vector<5x96xf32>
    %16 = tpu.matmul %14, %15, %cst_12 {dimension_numbers = #tpu.dot_dimension_numbers<[1], [0], [0], [1], [0, 0, 1, 1], [], []>} : vector<5x32xf32>, vector<32x96xf32>, vector<5x96xf32> -> vector<5x96xf32>
    %c200 = arith.constant 200 : index
    %c0_13 = arith.constant 0 : index
    %17 = vector.load %arg3[%c200, %c0_13] : memref<272x128xf32, #tpu.memory_space<vmem>>, vector<1x96xf32>
    %18 = vector.broadcast %17 : vector<1x96xf32> to vector<5x96xf32>
    %19 = arith.addf %16, %18 : vector<5x96xf32>
    %20 = vector.extract_strided_slice %19 {offsets = [0, 0], sizes = [5, 32], strides = [1, 1]} : vector<5x96xf32> to vector<5x32xf32>
    %21 = vector.extract_strided_slice %12 {offsets = [0, 0], sizes = [1, 32], strides = [1, 1]} : vector<1x96xf32> to vector<1x32xf32>
    %22 = vector.broadcast %21 : vector<1x32xf32> to vector<5x32xf32>
    %23 = arith.addf %20, %22 : vector<5x32xf32>
    %24 = arith.negf %23 : vector<5x32xf32>
    %25 = math.exp %24 : vector<5x32xf32>
    %cst_14 = arith.constant 1.000000e+00 : f32
    %26 = vector.broadcast %cst_14 : f32 to vector<5x32xf32>
    %27 = arith.addf %26, %25 : vector<5x32xf32>
    %28 = arith.divf %26, %27 : vector<5x32xf32>
    %29 = vector.extract_strided_slice %19 {offsets = [0, 32], sizes = [5, 32], strides = [1, 1]} : vector<5x96xf32> to vector<5x32xf32>
    %30 = vector.extract_strided_slice %12 {offsets = [0, 32], sizes = [1, 32], strides = [1, 1]} : vector<1x96xf32> to vector<1x32xf32>
    %31 = vector.broadcast %30 : vector<1x32xf32> to vector<5x32xf32>
    %32 = arith.addf %29, %31 : vector<5x32xf32>
    %33 = arith.negf %32 : vector<5x32xf32>
    %34 = math.exp %33 : vector<5x32xf32>
    %cst_15 = arith.constant 1.000000e+00 : f32
    %35 = vector.broadcast %cst_15 : f32 to vector<5x32xf32>
    %36 = arith.addf %35, %34 : vector<5x32xf32>
    %37 = arith.divf %35, %36 : vector<5x32xf32>
    %38 = vector.extract_strided_slice %19 {offsets = [0, 64], sizes = [5, 32], strides = [1, 1]} : vector<5x96xf32> to vector<5x32xf32>
    %39 = vector.extract_strided_slice %12 {offsets = [0, 64], sizes = [1, 32], strides = [1, 1]} : vector<1x96xf32> to vector<1x32xf32>
    %40 = vector.broadcast %39 : vector<1x32xf32> to vector<5x32xf32>
    %41 = arith.mulf %28, %40 : vector<5x32xf32>
    %42 = arith.addf %38, %41 : vector<5x32xf32>
    %43 = math.tanh %42 : vector<5x32xf32>
    %cst_16 = arith.constant 1.000000e+00 : f32
    %44 = vector.broadcast %cst_16 : f32 to vector<5x32xf32>
    %45 = arith.subf %44, %37 : vector<5x32xf32>
    %46 = arith.mulf %45, %43 : vector<5x32xf32>
    %47 = vector.broadcast %3 : vector<1x32xf32> to vector<5x32xf32>
    %48 = arith.mulf %37, %47 : vector<5x32xf32>
    %49 = arith.addf %46, %48 : vector<5x32xf32>
    %c64 = arith.constant 64 : index
    %c0_17 = arith.constant 0 : index
    %50 = vector.load %arg3[%c64, %c0_17] : memref<272x128xf32, #tpu.memory_space<vmem>>, vector<32x64xf32>
    %cst_18 = arith.constant dense<0.000000e+00> : vector<3x64xf32>
    %51 = tpu.matmul %6, %50, %cst_18 {dimension_numbers = #tpu.dot_dimension_numbers<[1], [0], [0], [1], [0, 0, 1, 1], [], []>} : vector<3x32xf32>, vector<32x64xf32>, vector<3x64xf32> -> vector<3x64xf32>
    %c128 = arith.constant 128 : index
    %c0_19 = arith.constant 0 : index
    %52 = vector.load %arg3[%c128, %c0_19] : memref<272x128xf32, #tpu.memory_space<vmem>>, vector<32x32xf32>
    %cst_20 = arith.constant dense<0.000000e+00> : vector<4x32xf32>
    %53 = tpu.matmul %7, %52, %cst_20 {dimension_numbers = #tpu.dot_dimension_numbers<[1], [0], [0], [1], [0, 0, 1, 1], [], []>} : vector<4x32xf32>, vector<32x32xf32>, vector<4x32xf32> -> vector<4x32xf32>
    %c96 = arith.constant 96 : index
    %c0_21 = arith.constant 0 : index
    %54 = vector.load %arg3[%c96, %c0_21] : memref<272x128xf32, #tpu.memory_space<vmem>>, vector<32x64xf32>
    %cst_22 = arith.constant dense<0.000000e+00> : vector<5x64xf32>
    %55 = tpu.matmul %49, %54, %cst_22 {dimension_numbers = #tpu.dot_dimension_numbers<[1], [0], [0], [1], [0, 0, 1, 1], [], []>} : vector<5x32xf32>, vector<32x64xf32>, vector<5x64xf32> -> vector<5x64xf32>
    %56 = vector.extract_strided_slice %51 {offsets = [0, 0], sizes = [3, 32], strides = [1, 1]} : vector<3x64xf32> to vector<3x32xf32>
    %57 = vector.broadcast %13 : vector<1x32xf32> to vector<3x32xf32>
    %58 = arith.addf %56, %57 : vector<3x32xf32>
    %c208 = arith.constant 208 : index
    %c0_23 = arith.constant 0 : index
    %59 = vector.load %arg3[%c208, %c0_23] : memref<272x128xf32, #tpu.memory_space<vmem>>, vector<1x32xf32>
    %60 = vector.broadcast %59 : vector<1x32xf32> to vector<3x32xf32>
    %61 = arith.addf %58, %60 : vector<3x32xf32>
    %62 = vector.extract_strided_slice %55 {offsets = [0, 0], sizes = [3, 32], strides = [1, 1]} : vector<5x64xf32> to vector<3x32xf32>
    %63 = vector.extract_strided_slice %51 {offsets = [0, 32], sizes = [3, 32], strides = [1, 1]} : vector<3x64xf32> to vector<3x32xf32>
    %64 = vector.extract_strided_slice %55 {offsets = [3, 32], sizes = [2, 32], strides = [1, 1]} : vector<5x64xf32> to vector<2x32xf32>
    %65 = tpu.concatenate %53, %62, %63, %64 in 0 : vector<4x32xf32>, vector<3x32xf32>, vector<3x32xf32>, vector<2x32xf32> -> vector<12x32xf32>
    %c16 = arith.constant 16 : index
    %c0_24 = arith.constant 0 : index
    %66 = vector.load %arg4[%c16, %c0_24] : memref<72x128xf32, #tpu.memory_space<vmem>>, vector<18x12xf32>
    %cst_25 = arith.constant dense<0.000000e+00> : vector<18x32xf32>
    %67 = tpu.matmul %66, %65, %cst_25 {dimension_numbers = #tpu.dot_dimension_numbers<[1], [0], [0], [1], [0, 0, 1, 1], [], []>} : vector<18x12xf32>, vector<12x32xf32>, vector<18x32xf32> -> vector<18x32xf32>
    %c224 = arith.constant 224 : index
    %c0_26 = arith.constant 0 : index
    %68 = vector.load %arg3[%c224, %c0_26] : memref<272x128xf32, #tpu.memory_space<vmem>>, vector<18x32xf32>
    %69 = arith.addf %67, %68 : vector<18x32xf32>
    %70 = tpu.concatenate %61, %69 in 0 : vector<3x32xf32>, vector<18x32xf32> -> vector<21x32xf32>
    %cst_27 = arith.constant 0.000000e+00 : f32
    %71 = vector.broadcast %cst_27 : f32 to vector<21x32xf32>
    %72 = arith.maximumf %70, %71 : vector<21x32xf32>
    %c160 = arith.constant 160 : index
    %c0_28 = arith.constant 0 : index
    %73 = vector.load %arg3[%c160, %c0_28] : memref<272x128xf32, #tpu.memory_space<vmem>>, vector<32x48xf32>
    %cst_29 = arith.constant dense<0.000000e+00> : vector<21x48xf32>
    %74 = tpu.matmul %72, %73, %cst_29 {dimension_numbers = #tpu.dot_dimension_numbers<[1], [0], [0], [1], [0, 0, 1, 1], [], []>} : vector<21x32xf32>, vector<32x48xf32>, vector<21x48xf32> -> vector<21x48xf32>
    %c216 = arith.constant 216 : index
    %c0_30 = arith.constant 0 : index
    %75 = vector.load %arg3[%c216, %c0_30] : memref<272x128xf32, #tpu.memory_space<vmem>>, vector<1x48xf32>
    %76 = vector.broadcast %75 : vector<1x48xf32> to vector<21x48xf32>
    %77 = arith.addf %74, %76 : vector<21x48xf32>
    %cst_31 = arith.constant 0.000000e+00 : f32
    %78 = vector.broadcast %cst_31 : f32 to vector<21x48xf32>
    %79 = arith.maximumf %77, %78 : vector<21x48xf32>
    %c248 = arith.constant 248 : index
    %c0_32 = arith.constant 0 : index
    %80 = vector.load %arg3[%c248, %c0_32] : memref<272x128xf32, #tpu.memory_space<vmem>>, vector<21x48xf32>
    %81 = arith.mulf %79, %80 : vector<21x48xf32>
    %cst_33 = arith.constant dense<0.000000e+00> : vector<21xf32>
    %82 = vector.multi_reduction <add>, %81, %cst_33 [1] : vector<21x48xf32> to vector<21xf32>
    %83 = vector.shape_cast %82 : vector<21xf32> to vector<21x1xf32>
    %c40 = arith.constant 40 : index
    %c0_34 = arith.constant 0 : index
    %84 = vector.load %arg4[%c40, %c0_34] : memref<72x128xf32, #tpu.memory_space<vmem>>, vector<21x128xf32>
    %c64_35 = arith.constant 64 : index
    %c0_36 = arith.constant 0 : index
    %85 = vector.load %arg4[%c64_35, %c0_36] : memref<72x128xf32, #tpu.memory_space<vmem>>, vector<1x128xf32>
    %86 = vector.broadcast %83 : vector<21x1xf32> to vector<21x128xf32>
    %87 = arith.mulf %86, %84 : vector<21x128xf32>
    %cst_37 = arith.constant dense<0.000000e+00> : vector<128xf32>
    %88 = vector.multi_reduction <add>, %87, %cst_37 [0] : vector<21x128xf32> to vector<128xf32>
    %89 = vector.shape_cast %88 : vector<128xf32> to vector<1x128xf32>
    %90 = arith.addf %89, %85 : vector<1x128xf32>
    %c0_38 = arith.constant 0 : index
    %c0_39 = arith.constant 0 : index
    %c0_40 = arith.constant 0 : index
    %91 = vector.load %arg5[%c0_38, %c0_39, %c0_40] : memref<1x1x128xf32, #tpu.memory_space<vmem>>, vector<1x1x128xf32>
    %92 = vector.shape_cast %91 : vector<1x1x128xf32> to vector<1x128xf32>
    %93 = vector.shape_cast %90 : vector<1x128xf32> to vector<1x1x128xf32>
    tpu.vector_store %arg5[%c0_38, %c0_39, %c0_40], %93 {strides = array<i32>} : memref<1x1x128xf32, #tpu.memory_space<vmem>>, vector<1x1x128xf32>,
    return
  }
  func.func @transform_0(%arg0: i32) -> (i32, i32, i32) {
    %c0_i32 = arith.constant 0 : i32
    %c0_i32_0 = arith.constant 0 : i32
    %c0_i32_1 = arith.constant 0 : i32
    return %arg0, %c0_i32, %c0_i32_0 : i32, i32, i32
  }
  func.func @transform_1(%arg0: i32) -> (i32, i32, i32) {
    %c0_i32 = arith.constant 0 : i32
    %c0_i32_0 = arith.constant 0 : i32
    %c0_i32_1 = arith.constant 0 : i32
    return %arg0, %c0_i32, %c0_i32_0 : i32, i32, i32
  }
  func.func @transform_2(%arg0: i32) -> (i32, i32) {
    %c0_i32 = arith.constant 0 : i32
    %c0_i32_0 = arith.constant 0 : i32
    %c0_i32_1 = arith.constant 0 : i32
    return %c0_i32, %c0_i32_0 : i32, i32
  }
  func.func @transform_3(%arg0: i32) -> (i32, i32) {
    %c0_i32 = arith.constant 0 : i32
    %c0_i32_0 = arith.constant 0 : i32
    %c0_i32_1 = arith.constant 0 : i32
    return %c0_i32, %c0_i32_0 : i32, i32
  }
  func.func @transform_4(%arg0: i32) -> (i32, i32, i32) {
    %c0_i32 = arith.constant 0 : i32
    %c0_i32_0 = arith.constant 0 : i32
    %c0_i32_1 = arith.constant 0 : i32
    return %arg0, %c0_i32, %c0_i32_0 : i32, i32, i32
  }
}

</mosaic_0001>

<bundles_post_ra>
// kernel: forward_batched.1
= control target key start
LH: loop header
LB: loop body
LE: loop exit
PB: predicated region body
PF: predicated region fallthrough
CT: control target
= control target key end

     0   :  { %9 = vsyncpa [#allocation3], 0  ;;  %s2058_s0 = inlined_call_operand.hbm [shape: f32[4,8,32], index: 0, kind: input, shape index: {}]   ;;  %s2059_s1 = inlined_call_operand.hbm [shape: f32[4,1,32], index: 1, kind: input, shape index: {}]   ;;  %s2060_s2 = inlined_call_operand.hbm [shape: f32[272,128], index: 2, kind: input, shape index: {}]   ;;  %s2061_s3 = inlined_call_operand.hbm [shape: f32[72,128], index: 3, kind: input, shape index: {}]   ;;  %s2062_s4 = inlined_call_operand.hbm [shape: f32[4,1,128], index: 4, kind: output, shape index: {}]  }
   0x1   :  { %11 = vsyncpa [#allocation3 + $0x1], 0 }
   0x2   :  { %12 = vsyncpa [#allocation6], 0 }
   0x3   :  { %14 = vsyncpa [#allocation6 + $0x1], 0 }
   0x4   :  { %15 = vsyncpa [#allocation9], 0 }
   0x5   :  { %16 = vsyncpa [#allocation4], 0 }
   0x6   :  { %18 = vsyncpa [#allocation4 + $0x1], 0  ;;  %s1730_s15 = smov 0   ;;  %s1732_s16 = smov 0  }
   0x7   :  { %s1734_s17 = smov 0   ;;  %s1736_s18 = smov 0  }
   0x8 LB: > { %s1751_s19 = sadd.s32 4294967295, %s1689_s18   ;;  %s1196_s20 = sadd.s32 4294967294, %s1689_s18   ;;  %s1689_s18 = sphi %s1736_s18, %s2085_s18   ;;  %s1685_s17 = sphi %s1734_s17, %s2084_s17   ;;  %s1681_s16 = sphi %s1732_s16, %s2083_s16   ;;  %s1677_s15 = sphi %s1730_s15, %s2082_s15  }
   0x9   : > { %p44_p0 = scmp.ne.s32.totalorder %s1681_s16, %s1677_s15  ;;  %p2063_p1 = scmp.eq.s32.totalorder %s1751_s19, 0 }
   0xa   : > { %p142_p3 = scmp.eq.s32.totalorder %s1196_s20, 3  ;;  %p1197_p5 = scmp.ge.s32.totalorder %s1689_s18, 1 }
   0xb   : > { %p1760_p4 = por %p2063_p1, %p44_p0  ;;  %p149_p7 = scmp.lt.s32.totalorder %s1689_s18, 5 }
   0xc   : > { %p1765_p6 = por %p142_p3, %p44_p0  ;;  %s1691_s24 = smov [#allocation7]  }
   0xd   : > { %s2067_s21 = scalar_select %p1760_p4, 1, 0 }
   0xe   : > { %s2068_s22 = scalar_select %p1765_p6, 1, 0 }
   0xf   : > { %p1770_p8 = pnand %p1197_p5, %p149_p7  ;;  %s161_s25 = sshll.u32 %s1691_s24, 4  ;;  %s162_s25 = int_to_ptr.vmem [resolvable:$true] %s161_s25 }
  0x10   : > { %s1692_s27 = smov [#allocation8]   ;;  %s1495_s5 = scalar_lea.hbm %s2060_s2, 4352 }
  0x11   : > { %s2069_s23 = scalar_select %p1770_p8, 1, 0 }
  0x12   : > { %p1417_p9 = pneg %p1770_p8  ;;  %s174_s28 = sshll.u32 %s1692_s27, 4  ;;  %s1782_s28 = int_to_ptr.vmem [resolvable:$true] %s174_s28 }
  0x13   : > { %p1496_p11 = scmp.ne.s32.totalorder %s2060_s2, %s1495_s5  ;;  %p1502_p3 = scmp.lt.u32.totalorder %s1495_s5, %s2060_s2 }
  0x14   : > { %p1778_p10 = pnand %p1417_p9, %p2063_p1 }
  0x16   : > { %p1497_p12 = pneg %p1778_p10 }
  0x18   : > { %p1498_p13 = pnand %p1497_p12, %p1496_p11 }
  0x1a   : > { %p1499_p0 = pneg %p1498_p13 }
  0x1c   : > { %p1504_p5 = pnand %p1502_p3, %p1499_p0 }
  0x1e   : > { %1507 = shalt.err (!%p1504_p5)
}
  0x1f   : > { %s1508_s10 = scalar_lea.vmem %s162_s25, 4352  ;;  %p1516_p2 = scmp.lt.s32.totalorder %s162_s25, %s162_s25 }
  0x20   : > { %p1509_p7 = scmp.ne.s32.totalorder %s162_s25, %s1508_s10  ;;  %p1517_p6 = scmp.lt.s32.totalorder %s1508_s10, %s1508_s10 }
  0x22   : > { %p1511_p9 = pnand %p1509_p7, %p1497_p12  ;;  %p1518_p4 = por %p1517_p6, %p1516_p2 }
  0x24   : > { %p1512_p1 = pneg %p1511_p9 }
  0x26   : > { %p1519_p8 = pnand %p1518_p4, %p1512_p1 }
  0x28   : > { %1522 = shalt.err (!%p1519_p8)
}
  0x29   : > { %s1693_s11 = smov 128   ;;  %s1694_s12 = smov 8  }
  0x2a   : > { %1420 = dma.hbm_to_vmem [thread:$0]  (!%p1778_p10), %s2060_s2, 4352, %s162_s25, [#allocation6], %s1693_s11, %s1693_s11, %s1694_s12  }
  0x2b   : > { %s1523_s27 = scalar_lea.hbm %s2061_s3, 1152 }
  0x2c   : > { %p1524_p11 = scmp.ne.s32.totalorder %s2061_s3, %s1523_s27  ;;  %p1530_p4 = scmp.lt.u32.totalorder %s1523_s27, %s2061_s3 }
  0x2e   : > { %p1526_p1 = pnand %p1524_p11, %p1497_p12 }
  0x30   : > { %p1527_p2 = pneg %p1526_p1 }
  0x32   : > { %p1532_p6 = pnand %p1530_p4, %p1527_p2 }
  0x34   : > { %1535 = shalt.err (!%p1532_p6)
}
  0x35   : > { %s1536_s25 = scalar_lea.vmem %s1782_s28, 1152  ;;  %p1544_p3 = scmp.lt.s32.totalorder %s1782_s28, %s1782_s28 }
  0x36   : > { %p1537_p8 = scmp.ne.s32.totalorder %s1782_s28, %s1536_s25  ;;  %p1545_p5 = scmp.lt.s32.totalorder %s1536_s25, %s1536_s25 }
  0x38   : > { %p1539_p13 = pnand %p1537_p8, %p1497_p12  ;;  %p1546_p7 = por %p1545_p5, %p1544_p3 }
  0x3a   : > { %p1540_p0 = pneg %p1539_p13 }
  0x3c   : > { %p1547_p9 = pnand %p1546_p7, %p1540_p0 }
  0x3e   : > { %1550 = shalt.err (!%p1547_p9)
}
  0x3f   : > { %1423 = dma.hbm_to_vmem [thread:$0]  (!%p1778_p10), %s2061_s3, 1152, %s1782_s28, [#allocation9], %s1693_s11, %s1693_s11, %s1694_s12  }
  0x40   : > { %s1832_s9 = sadd.s32 1, %s1689_s18   ;;  %s31_s26 = sadd.s32 1, %s1685_s17 }
  0x41   : > { %s28_s10 = ssub.s32 %s1689_s18, %s1832_s9  ;;  %p38_p12 = scmp.ne.s32.totalorder %s1685_s17, %s1681_s16 }
  0x42   : > { %p29_p11 = scmp.eq.s32.totalorder %s28_s10, 0  ;;  %p39_p1 = scmp.eq.s32.totalorder %s1689_s18, 0 }
  0x43   : > { %p2071_p2 = scmp.eq.s32.totalorder %s1751_s19, 3  ;;  %p1437_p6 = scmp.lt.s32.totalorder %s1689_s18, 4 }
  0x44   : > { %s1848_s14 = scalar_select %p29_p11, %s1685_s17, %s31_s26  }
  0x45   : > { %p1842_p4 = por %p2071_p2, %p38_p12  ;;  %p40_p8 = por %p39_p1, %p38_p12 }
  0x46   : > { %s1851_s20 = sand.u32 1, %s1685_s17   ;;  %s1202_s11 = sshll.u32 %s1689_s18, 7 }
  0x47   : > { %s2072_s13 = scalar_select %p1842_p4, 1, 0 }
  0x48   : > { %s1201_s28 = sshll.u32 %s1851_s20, 3  ;;  %s1858_s27 = scalar_lea.hbm %s2058_s0, %s1202_s11 }
  0x49   : > { %s192_s29 = scalar_lea.vmem [#allocation2], %s1201_s28  ;;  %p1862_p10 = pnand %p1437_p6, %p40_p8 }
  0x4a   : > { %s199_s30 = sshll.u32 %s192_s29, 4  ;;  %s206_s6 = sand.u32 1, %s1689_s18   ;;  %s1860_s30 = int_to_ptr.vmem [resolvable:$true] %s199_s30 }
  0x4b   : > { %s189_s25 = scalar_lea.sflag [#allocation3], %s1851_s20  ;;  %s1551_s7 = scalar_lea.hbm %s1858_s27, 128 }
  0x4c   : > { %p1552_p13 = scmp.ne.s32.totalorder %s1858_s27, %s1551_s7  ;;  %p1553_p0 = pneg %p1862_p10 }
  0x4d   : > { %s1556_s10 = scalar_lea.hbm %s2058_s0, 512  ;;  %p1557_p7 = scmp.lt.u32.totalorder %s1858_s27, %s2058_s0 }
  0x4e   : > { %p1554_p3 = pnand %p1553_p0, %p1552_p13  ;;  %p1558_p9 = scmp.lt.u32.totalorder %s1556_s10, %s1551_s7 }
  0x4f   : > { %p1560_p11 = scmp.lt.u32.totalorder %s1551_s7, %s1858_s27 }
  0x50   : > { %p1555_p5 = pneg %p1554_p3  ;;  %p1559_p12 = por %p1558_p9, %p1557_p7 }
  0x52   : > { %p1561_p1 = por %p1560_p11, %p1559_p12 }
  0x54   : > { %p1562_p2 = pnand %p1561_p1, %p1555_p5 }
  0x56   : > { %1565 = shalt.err (!%p1562_p2)
}
  0x57   : > { %s1566_s12 = scalar_lea.vmem %s1860_s30, 128  ;;  %s1695_s24 = smov [#allocation2]  }
  0x58   : > { %p1567_p6 = scmp.ne.s32.totalorder %s1860_s30, %s1566_s12  ;;  %s1571_s29 = sshll.u32 %s1695_s24, 4  ;;  %s1572_s29 = int_to_ptr.vmem [resolvable:$false] %s1571_s29 }
  0x59   : > { %s1573_s8 = scalar_lea.vmem %s1572_s29, 256  ;;  %p1574_p3 = scmp.lt.s32.totalorder %s1860_s30, %s1572_s29 }
  0x5a   : > { %p1569_p8 = pnand %p1567_p6, %p1553_p0  ;;  %p1575_p7 = scmp.lt.s32.totalorder %s1573_s8, %s1566_s12 }
  0x5c   : > { %p1570_p13 = pneg %p1569_p8  ;;  %p1576_p9 = por %p1575_p7, %p1574_p3 }
  0x5e   : > { %p1577_p12 = pnand %p1576_p9, %p1570_p13 }
  0x60   : > { %1580 = shalt.err (!%p1577_p12)
}
  0x61   : > { %1427 = dma.hbm_to_vmem [thread:$0]  (!%p1862_p10), %s1858_s27, 128, %s1860_s30, %s189_s25  }
  0x62   : > { %s1203_s7 = sshll.u32 %s1689_s18, 4  ;;  %s209_s26 = scalar_lea.vmem [#allocation5], %s1851_s20 }
  0x63   : > { %s216_s10 = sshll.u32 %s209_s26, 4  ;;  %s1898_s24 = scalar_lea.hbm %s2059_s1, %s1203_s7  ;;  %s217_s10 = int_to_ptr.vmem [resolvable:$true] %s216_s10 }
  0x64   : > { %s207_s12 = scalar_lea.sflag [#allocation6], %s206_s6  ;;  %s1581_s29 = scalar_lea.hbm %s1898_s24, 16 }
  0x65   : > { %p1582_p5 = scmp.ne.s32.totalorder %s1898_s24, %s1581_s29  ;;  %s1586_s30 = scalar_lea.hbm %s2059_s1, 64 }
  0x66   : > { %p1587_p2 = scmp.lt.u32.totalorder %s1898_s24, %s2059_s1  ;;  %p1588_p6 = scmp.lt.u32.totalorder %s1586_s30, %s1581_s29 }
  0x67   : > { %p1584_p11 = pnand %p1582_p5, %p1553_p0  ;;  %p1590_p13 = scmp.lt.u32.totalorder %s1581_s29, %s1898_s24 }
  0x68   : > { %p1589_p8 = por %p1588_p6, %p1587_p2 }
  0x69   : > { %p1585_p1 = pneg %p1584_p11 }
  0x6a   : > { %p1591_p3 = por %p1590_p13, %p1589_p8 }
  0x6c   : > { %p1592_p7 = pnand %p1591_p3, %p1585_p1 }
  0x6e   : > { %1595 = shalt.err (!%p1592_p7)
}
  0x6f   : > { %s1596_s6 = scalar_lea.vmem %s217_s10, 16  ;;  %s1696_s7 = smov [#allocation5]  }
  0x70   : > { %p1597_p9 = scmp.ne.s32.totalorder %s217_s10, %s1596_s6  ;;  %s1601_s26 = sshll.u32 %s1696_s7, 4  ;;  %s1602_s26 = int_to_ptr.vmem [resolvable:$false] %s1601_s26 }
  0x71   : > { %s1603_s28 = scalar_lea.vmem %s1602_s26, 32  ;;  %p1604_p11 = scmp.lt.s32.totalorder %s217_s10, %s1602_s26 }
  0x72   : > { %p1599_p12 = pnand %p1597_p9, %p1553_p0  ;;  %p1605_p4 = scmp.lt.s32.totalorder %s1603_s28, %s1596_s6 }
  0x74   : > { %p1600_p5 = pneg %p1599_p12  ;;  %p1606_p2 = por %p1605_p4, %p1604_p11 }
  0x76   : > { %p1607_p6 = pnand %p1606_p2, %p1600_p5 }
  0x78   : > { %1610 = shalt.err (!%p1607_p6)
}
  0x79   : > { %1430 = dma.hbm_to_vmem [thread:$0]  (!%p1862_p10), %s1898_s24, 16, %s217_s10, %s207_s12  }
  0x7a   : > { %p2074_p1 = scmp.ne.s32.totalorder %s2069_s23, 0 }
  0x7b   : > { %s1924_s11 = sand.u32 (!%p2074_p1), 1, %s1681_s16   ;;  %p2075_p0 = scmp.ne.s32.totalorder (!%p2074_p1), %s2067_s21, 0 }
  0x7c   : > { %225 = sbr.rel (%p2074_p1) target bundleno = 1928 (0x788), region = 36  ;;  %s1205_s29 = sshll.u32 (!%p2074_p1), %s1924_s11, 3 }
  0x7d   : > { %s228_s20 = scalar_lea.sflag (!%p2074_p1), [#allocation3], %s1924_s11  ;;  %s231_s27 = scalar_lea.vmem (!%p2074_p1), [#allocation2], %s1205_s29 }
  0x83   : > { %1656 = dma.done.wait (%p2075_p0), %s228_s20, 128  }
  0x84   : > { %1658 = vsyncadd (%p2075_p0), %s228_s20, 4294967168  ;;  %s236_s5 = sand.u32 1, %s1751_s19   ;;  %s239_s10 = scalar_lea.vmem [#allocation5], %s1924_s11 }
  0x85   : > { %s237_s23 = scalar_lea.sflag [#allocation6], %s236_s5 }
  0x86   : > { %1660 = dma.done.wait (%p2075_p0), %s237_s23, 16  }
  0x87   : > { %1662 = vsyncadd (%p2075_p0), %s237_s23, 4294967280  ;;  %p2076_p4 = scmp.eq.s32.totalorder %s1751_s19, 0 }
  0x89   : > { %1664 = dma.done.wait (%p2076_p4), [#allocation6], 4352   ;;  %p2077_p10 = pmov %p2076_p4 }
  0x8a   : > { %p2078_p8 = pmov %p2076_p4 }
  0x8b   : > { %1666 = vsyncadd (%p2077_p10), [#allocation6], 4294962944 }
  0x8c   : > { %1668 = dma.done.wait (%p2078_p8), [#allocation9], 1152   ;;  %p2079_p13 = pmov %p2076_p4 }
  0x8d   : > { %v1697_v0 = vmov 0.0|0.0   ;;  %vm1698_vm0 = vmmov 0   ;;  %v1699_v1 = vmov 0.0   ;;  %vm279_vm1 = vcmask 64512   ;;  %v275_v2 = vld [vmem:[%s231_s27] sm:$0xff]  ;;  %v361_v5 = vld [vmem:[#allocation7] sm:$0xff] }
  0x8e   : > { %1670 = vsyncadd (%p2079_p13), [#allocation9], 4294966144  ;;  %1359 = vmatprep.subr.bf16.mxu1 %v1697_v0  ;;  %1282 = vmatprep.mubr.msk.f32.mxu1 %vm1698_vm0, %v1699_v1  ;;  %v277_v3 = vld [vmem:[#allocation8] sm:$0xff]  ;;  %v278_v4 = vld [vmem:[#allocation8 + $0x8] sm:$0x1]  ;;  %vm365_vm2 = vcmask 261120   ;;  %v523_v32 = vlaneseq }
  0x8f   : > { %1269 = vmatprep.subr.mxu0 %v275_v2  ;;  %1271 = vmatprep.mubr.msk.f32.mxu0 %vm279_vm1, %v277_v3  ;;  %v362_v6 = vld [vmem:[#allocation7 + $0x8] sm:$0xff]  ;;  %v363_v7 = vld [vmem:[#allocation7 + $0x10] sm:$0xff]  ;;  %v364_v9 = vld [vmem:[#allocation7 + $0x18] sm:$0xff]  ;;  %vm639_vm3 = vcmask 1042432   ;;  %s1700_s21 = smov 64   ;;  %s1701_s24 = smov 96  }
  0x90   : > { %1270 = vmatpush3.msra.mxu0 %v275_v2  ;;  %v1360_v8 = vpack.c.bf16 %v362_v6, %v361_v5  ;;  %v441_v10 = vld [vmem:[#allocation7 + $0x20] sm:$0xff]  ;;  %v442_v11 = vld [vmem:[#allocation7 + $0x28] sm:$0xff]  ;;  %v1363_v12 = vpack.c.bf16 %v364_v9, %v363_v7  ;;  %v443_v14 = vld [vmem:[#allocation7 + $0x30] sm:$0xff]  ;;  %v524_v36 = vshrl.u32 %v523_v32, 7  ;;  %s1702_s12 = smov 32   ;;  %vm821_vm4 = vcmask 1043456  }
  0x91   : > { %1272 = vmatmul.mubr.msk.f32.vlgmr.msra.gmra.mrb[0].mxu0 %vm279_vm1, %v278_v4  ;;  %1365 = vmatprep.subr.bf16.mxu0 %v1697_v0  ;;  %v1366_v13 = vpack.c.bf16 %v442_v11, %v441_v10  ;;  %v444_v15 = vld [vmem:[#allocation7 + $0x38] sm:$0xff]  ;;  %v560_v16 = vld [vmem:[#allocation7 + $0x40] sm:$0xff]  ;;  %v561_v17 = vld [vmem:[#allocation7 + $0x48] sm:$0xff]  ;;  %vm823_vm5 = vcmask 1046528   ;;  %vm825_vm6 = vcmask 1041408   ;;  %vm1703_vm7 = vmmov 1  }
  0x92   : > { %1361 = vmatpush3.bf16.msra.mxu1 %v1360_v8  ;;  %1293 = vmatprep.mubr.msk.f32.mxu0 %vm1698_vm0, %v1699_v1  ;;  %v1369_v18 = vpack.c.bf16 %v444_v15, %v443_v14  ;;  %v1956_v19 = vld [vmem:[%s239_s10] sm:$0x1]  ;;  %v1372_v20 = vpack.c.bf16 %v561_v17, %v560_v16  ;;  %v562_v21 = vld [vmem:[#allocation7 + $0x50] sm:$0xff]  ;;  %v563_v22 = vld [vmem:[#allocation7 + $0x58] sm:$0xff]  ;;  %v525_v40 = vsub.s32 0, %v524_v36  ;;  %vm833_vm9 = vcmask 97280  }
  0x93   : > { %1362 = vmatprep.subr.bf16.mxu1 %v1697_v0  ;;  %1367 = vmatpush3.bf16.msra.mxu0 %v1366_v13  ;;  %v1375_v23 = vpack.c.bf16 %v563_v22, %v562_v21  ;;  %v634_v24 = vld [vmem:[#allocation7 + $0x80] sm:$0xff]  ;;  %v635_v25 = vld [vmem:[#allocation7 + $0x88] sm:$0xff]  ;;  %v636_v28 = vld [vmem:[#allocation7 + $0x90] sm:$0xff]  ;;  %vm1048_vm10 = vcmask 392192   ;;  %vm1055_vm11 = vcmask 389120   ;;  %vm1067_vm12 = vcmask 1044480  }
  0x94   : > { %1368 = vmatprep.subr.bf16.mxu0 %v1697_v0  ;;  %v1378_v26 = vpack.c.bf16 %v635_v25, %v634_v24  ;;  %v637_v29 = vld [vmem:[#allocation7 + $0x98] sm:$0xff]  ;;  %v439_v37 = vld [vmem:[#allocation7 + $0xc0] sm:$0x1]  ;;  %v1211_v43 = vld [vmem:[#allocation7 + $0xc8] ss:$0 sm:$0xff]  ;;  %v554_v2 = vrot.slane %v1956_v19, %v525_v40  ;;  %s1226_s30 = sshll.u32 %s1751_s19, 4 }
  0x95   : > { %v1381_v34 = vpack.c.bf16 %v637_v29, %v636_v28  ;;  %v715_v61 = vld [vmem:[#allocation7 + $0x60] sm:$0xff]  ;;  %v716_v62 = vld [vmem:[#allocation7 + $0x68] sm:$0xff]  ;;  %v717_v63 = vld [vmem:[#allocation7 + $0x70] sm:$0xff]  ;;  %s274_s25 = scalar_lea.vmem [#allocation10], %s1924_s11  ;;  %s2015_s26 = scalar_lea.hbm %s2062_s4, %s1226_s30 }
  0x96   : > { %1364 = vmatpush3.bf16.msra.mxu1 %v1363_v12  ;;  %v1384_v3 = vpack.c.bf16 %v716_v62, %v715_v61  ;;  %v718_v4 = vld [vmem:[#allocation7 + $0x78] sm:$0xff]  ;;  %vm1391_vm8 = vmpackc.low %vm821_vm4, %vm1703_vm7  ;;  %v828_v28 = vld [vmem:[#allocation8 + $0x18] sm:$0xff]  ;;  %s1091_s8 = sshll.u32 %s274_s25, 4  ;;  %s1079_s28 = scalar_lea.sflag [#allocation4], %s1924_s11  ;;  %s2017_s8 = int_to_ptr.vmem [resolvable:$true] %s1091_s8 }
  0x97   : > { %1371 = vmatprep.subr.bf16.mxu1 %v1697_v0  ;;  %1370 = vmatpush3.bf16.msra.mxu0 %v1369_v18  ;;  %v1387_v5 = vpack.c.bf16 %v718_v4, %v717_v63  ;;  %v829_v29 = vld [vmem:[#allocation8 + $0x20] sm:$0x3]  ;;  %s1611_s29 = scalar_lea.vmem %s2017_s8, 16  ;;  %p2080_p7 = scmp.ne.s32.totalorder %s2072_s13, 0 }
  0x98   : > { %1377 = vmatprep.subr.bf16.mxu0 %v1697_v0  ;;  %p1612_p3 = scmp.ne.s32.totalorder %s2017_s8, %s1611_s29  ;;  %s1704_s19 = smov [#allocation10]  }
  0x99   : > { %1283 = vmatmul.mubr.msk.f32.vlgmr.msra.gmra.mrb[0].mxu1 %vm365_vm2, %v1956_v19  ;;  %s1615_s20 = sshll.u32 %s1704_s19, 4  ;;  %s1616_s20 = int_to_ptr.vmem [resolvable:$false] %s1615_s20 }
  0x9a   : > { %1373 = vmatpush3.bf16.msra.mxu1 %v1372_v20  ;;  %1304 = vmatprep.mubr.msk.f32.mxu1 %vm1698_vm0, %v1699_v1  ;;  %p1613_p9 = pnand %p1612_p3, %p2080_p7  ;;  %s1617_s27 = scalar_lea.vmem %s1616_s20, 32 }
  0x9b   : > { %1374 = vmatprep.subr.bf16.mxu1 %v1697_v0  ;;  %p1618_p5 = scmp.lt.s32.totalorder %s2017_s8, %s1616_s20  ;;  %p1619_p11 = scmp.lt.s32.totalorder %s1617_s27, %s1611_s29 }
  0x9c   : > { %p1614_p12 = pneg %p1613_p9 }
  0x9d   : > { %p1620_p2 = por %p1619_p11, %p1618_p5 }
  0x9e   : > { %1376 = vmatpush3.bf16.msra.mxu1 %v1375_v23 }
  0x9f   : > { %1383 = vmatprep.subr.bf16.mxu1 %v1697_v0  ;;  %p1621_p6 = pnand %p1620_p2, %p1614_p12 }
 0x164   : > { %v1273_v27 = vpop.f32.mrb[0].mxu0 }
 0x165   : > { %v641_v30 = vrot.slane %v1273_v27, 5  ;;  %v352_v31 = vpop.f32.mrb[1].mxu0  ;;  %v827_v27 = vld [vmem:[#allocation8 + $0x10] sm:$0xff] }
 0x166   : > { %v640_v33 = vrot.slane %v352_v31, 5  ;;  %1294 = vmatmul.mubr.msk.f32.vlgmr.msra.gmra.mrb[2].mxu0 %vm365_vm2, %v352_v31  ;;  %1305 = vmatmul.mubr.msk.f32.vlgmr.msra.gmra.mrb[2].mxu1 %vm365_vm2, %v352_v31  ;;  %v942_v31 = vld [vmem:[#allocation7 + $0xa8] sm:$0xff] }
 0x167   : > { %1379 = vmatpush3.bf16.msra.mxu0 %v1378_v26  ;;  %1315 = vmatprep.mubr.msk.f32.mxu0 %vm1698_vm0, %v1699_v1 }
 0x168   : > { %1380 = vmatprep.subr.bf16.mxu0 %v1697_v0  ;;  %v642_v35 = vsel %vm639_vm3, %v640_v33, %v641_v30  ;;  %1326 = vmatprep.mubr.msk.f32.mxu1 %vm1698_vm0, %v1699_v1  ;;  %v941_v30 = vld [vmem:[#allocation7 + $0xa0] sm:$0xff]  ;;  %v943_v33 = vld [vmem:[#allocation7 + $0xb0] sm:$0xff] }
 0x169   : > { %1385 = vmatpush3.bf16.msra.mxu1 %v1384_v3  ;;  %v1394_v32 = vpack.c.bf16 %v942_v31, %v941_v30 }
 0x16a   : > { %1386 = vmatprep.subr.bf16.mxu1 %v1697_v0 }
 0x16b   : > { %1382 = vmatpush3.bf16.msra.mxu0 %v1381_v34  ;;  %v944_v34 = vld [vmem:[#allocation7 + $0xb8] sm:$0xff] }
 0x16c   : > { %v435_v38 = vpop.f32.mrb[0].mxu1  ;;  %1389 = vmatprep.subr.bf16.mxu0 %v1697_v0 }
 0x16d   : > { %v440_v39 = vadd.f32 %v439_v37, %v435_v38  ;;  %v1284_v41 = vpop.f32.mrb[1].mxu1  ;;  %1388 = vmatpush3.bf16.msra.mxu1 %v1387_v5  ;;  %v797_v12 = vrot.slane %v435_v38, %v525_v40  ;;  %v830_v37 = vld [vmem:[#allocation7 + $0xe0] sm:$0xff] }
 0x16e   : > { %1316 = vmatmul.mubr.msk.f32.vlgmr.msra.gmra.mrb[4].mxu0 %vm365_vm2, %v642_v35  ;;  %1399 = vmatprep.subr.bf16.mxu1 %v1697_v0  ;;  %v1397_v35 = vpack.c.bf16 %v944_v34, %v943_v33 }
 0x16f   : > { %v526_v42 = vrot.slane %v440_v39, %v525_v40  ;;  %1333 = vmatprep.mubr.msk.f32.mxu0 %vm1698_vm0, %v1699_v1  ;;  %v1217_v39 = vld [vmem:[#allocation7 + $0xd0] ss:$0 sm:$0xff] }
 0x171   : > { %535 = vrot.lane.b32.xlu0 %v526_v42, %s1700_s21 }
 0x1e3   : > { %v536_v55 = vpop.permute.xlu0 %535 }
 0x239   : > { %v519_v44 = vpop.f32.mrb[2].mxu0  ;;  %v1978_v45 = vpop.f32.mrb[2].mxu1 }
 0x23a   : > { %v520_v46 = vadd.f32 %v1211_v43, %v519_v44  ;;  %v1295_v47 = vpop.f32.mrb[3].mxu0  ;;  %v1306_v48 = vpop.f32.mrb[3].mxu1  ;;  %v813_v15 = vrot.slane %v1978_v45, 1  ;;  %v831_v43 = vld [vmem:[#allocation7 + $0xe8] sm:$0xff] }
 0x23c   : > { %v527_v49 = vadd.f32 %v526_v42, %v520_v46 }
 0x23e   : > { %v1213_v50 = vmul.f32 -1.442695, %v527_v49 }
 0x240   : > { %1489 = vpow2.f32 %v1213_v50 }
 0x241   : > { %v711_v51 = vpop.f32.mrb[4].mxu0 }
 0x242   : > { %v1317_v52 = vpop.f32.mrb[5].mxu0 }
 0x24a   : > { %v1490_v53 = vpop.eup %1489 }
 0x24b   : > { %v531_v54 = vadd.f32 1.0, %v1490_v53 }
 0x24d   : > { %1491 = vrcp.f32 %v531_v54 }
 0x257   : > { %v1492_v56 = vpop.eup %1491 }
 0x258   : > { %v538_v57 = vmul.f32 %v1492_v56, %v536_v55  ;;  %v545_v7 = vsub.f32 1.0, %v1492_v56 }
 0x25a   : > { %540 = vrot.lane.b32.xlu0 %v538_v57, %s1700_s21 }
 0x2cc   : > { %v541_v58 = vpop.permute.xlu0 %540 }
 0x2cd   : > { %v543_v59 = vadd.f32 %v541_v58, %v520_v46 }
 0x2cf   : > { %1493 = vtanh.f32 %v543_v59 }
 0x2d9   : > { %v1494_v60 = vpop.eup %1493 }
 0x2da   : > { %547 = vrot.lane.b32.xlu1 %v1494_v60, %s1701_s24  ;;  %v1222_v60 = vld [vmem:[#allocation7 + $0xd8] ss:$0 sm:$0xff] }
 0x2de   : > { %555 = vrot.lane.b32.xlu1 %v554_v2, %s1702_s12  ;;  %v1042_v2 = vld [vmem:[#allocation7 + $0xf8] sm:$0xff] }
 0x34c   : > { %v548_v6 = vpop.permute.xlu1 %547 }
 0x34d   : > { %v550_v9 = vmul.f32 %v548_v6, %v545_v7 }
 0x350   : > { %v556_v8 = vpop.permute.xlu1 %555 }
 0x351   : > { %v558_v10 = vmul.f32 %v1492_v56, %v556_v8  ;;  %v1043_v8 = vld [vmem:[#allocation7 + $0x100] sm:$0xff] }
 0x353   : > { %v559_v11 = vadd.f32 %v558_v10, %v550_v9 }
 0x355   : > { %720 = vrot.lane.b32.xlu0 %v559_v11, %s1701_s24 }
 0x359   : > { %799 = vrot.lane.b32.xlu0 %v797_v12, %s1702_s12 }
 0x3c7   : > { %v721_v13 = vpop.permute.xlu0 %720 }
 0x3c8   : > { %1327 = vmatmul.mubr.msk.f32.vlgmr.msra.gmra.mrb[4].mxu1 %vm365_vm2, %v721_v13 }
 0x3c9   : > { %1353 = vmatprep.mubr.msk.f32.mxu1 %vm1698_vm0, %v1699_v1  ;;  %1401 = vmatpush3.bf16.msra.mxu1 %v1394_v32 }
 0x3ca   : > { %1400 = vmatprep.subr.bf16.mxu1 %v1697_v0 }
 0x3cb   : > { %v800_v36 = vpop.permute.xlu0 %799 }
 0x3cc   : > { %v802_v38 = vadd.f32 %v800_v36, %v1978_v45  ;;  %v1062_v36 = vld [vmem:[#allocation8 + $0x40] sm:$0x1] }
 0x3cd   : > { %1402 = vmatpush3.bf16.msra.mxu1 %v1397_v35 }
 0x3ce   : > { %v808_v44 = vadd.f32 %v1217_v39, %v802_v38 }
 0x49b   : > { %v790_v14 = vpop.f32.mrb[4].mxu1 }
 0x49c   : > { %v817_v16 = vrot.slane %v790_v14, 1  ;;  %v810_v17 = vrot.slane %v790_v14, 4  ;;  %v1328_v18 = vpop.f32.mrb[5].mxu1  ;;  %v1044_v14 = vld [vmem:[#allocation7 + $0x108] sm:$0x1f] }
 0x49e   : > { %v1484_v19 = vpack.i.bf16 %v817_v16, %v813_v15  ;;  %v822_v20 = vsel %vm821_vm4, %v711_v51, %v810_v17  ;;  %v832_v51 = vld [vmem:[#allocation7 + $0xf0] sm:$0x3] }
 0x4a0   : > { %1485 = vrot.lane.b32.xlu1 %v1484_v19, %s1701_s24  ;;  %v1060_v19 = vld [vmem:[#allocation8 + $0x30] sm:$0xff] }
 0x512   : > { %v1486_v21 = vpop.permute.xlu1 %1485 }
 0x513   : > { %v1488_v22 = vunpack.i.h.bf16 %v1486_v21  ;;  %v1487_v23 = vunpack.i.l.bf16 %v1486_v21  ;;  %v1059_v21 = vld [vmem:[#allocation8 + $0x28] sm:$0xff] }
 0x515   : > { %v824_v24 = vsel %vm823_vm5, %v822_v20, %v1487_v23  ;;  %v826_v25 = vsel %vm825_vm6, %v1487_v23, %v1488_v22 }
 0x516   : > { %v1390_v26 = vpack.c.bf16 %v826_v25, %v824_v24  ;;  %v1061_v24 = vld [vmem:[#allocation8 + $0x38] sm:$0x1f] }
 0x518   : > { %1392 = vmatpush3.bf16.msk.msra.mxu0 %vm1391_vm8, %v1390_v26 }
 0x519   : > { %1393 = vmatprep.subr.bf16.mxu0 %v1697_v0 }
 0x51b   : > { %1334 = vmatmul.mubr.msk.f32.vlgmr.msra.gmra.mrb[6].mxu0 %vm833_vm9, %v827_v27 }
 0x51c   : > { %1336 = vmatprep.mubr.msk.f32.mxu0 %vm1698_vm0, %v1699_v1  ;;  %1395 = vmatpush3.bf16.msra.mxu0 %v1394_v32 }
 0x51d   : > { %1396 = vmatprep.subr.bf16.mxu0 %v1697_v0 }
 0x51f   : > { %1337 = vmatmul.mubr.msk.f32.gmra.mrb[8].mxu0 %vm833_vm9, %v828_v28 }
 0x520   : > { %1339 = vmatprep.mubr.msk.f32.mxu0 %vm1698_vm0, %v1699_v1  ;;  %1398 = vmatpush3.bf16.msra.mxu0 %v1397_v35 }
 0x523   : > { %1340 = vmatmul.mubr.msk.f32.gmra.mrb[10].mxu0 %vm833_vm9, %v829_v29 }
 0x524   : > { %1350 = vmatprep.mubr.msk.f32.mxu0 %vm1698_vm0, %v1699_v1 }
 0x5ee   : > { %v912_v40 = vpop.f32.mrb[6].mxu0 }
 0x5ef   : > { %v913_v41 = vadd.f32 %v912_v40, %v830_v37  ;;  %v1335_v42 = vpop.f32.mrb[7].mxu0 }
 0x5f1   : > { %v929_v46 = vrot.slane %v913_v41, 5 }
 0x5f2   : > { %v917_v47 = vpop.f32.mrb[8].mxu0 }
 0x5f3   : > { %v937_v48 = vsel %vm639_vm3, %v808_v44, %v929_v46  ;;  %v918_v49 = vadd.f32 %v917_v47, %v831_v43  ;;  %v1338_v50 = vpop.f32.mrb[9].mxu0 }
 0x5f4   : > { %v938_v0 = vmax.f32 %v937_v48, 0.0 }
 0x5f5   : > { %v930_v52 = vrot.slane %v918_v49, 5 }
 0x5f6   : > { %v922_v53 = vpop.f32.mrb[10].mxu0  ;;  %1351 = vmatmul.mubr.msk.f32.vlgmr.msra.gmra.mrb[12].mxu0 %vm365_vm2, %v938_v0 }
 0x5f7   : > { %v931_v45 = vsel %vm639_vm3, %v929_v46, %v930_v52  ;;  %v923_v54 = vadd.f32 %v922_v53, %v832_v51  ;;  %v1341_v55 = vpop.f32.mrb[11].mxu0 }
 0x5f8   : > { %v939_v56 = vmax.f32 %v931_v45, 0.0 }
 0x5f9   : > { %v932_v57 = vrot.slane %v923_v54, 5 }
 0x5fa   : > { %1354 = vmatmul.mubr.msk.f32.vlgmr.msra.gmra.mrb[6].mxu1 %vm365_vm2, %v939_v56 }
 0x5fb   : > { %v933_v58 = vsel %vm639_vm3, %v930_v52, %v932_v57  ;;  %1356 = vmatprep.mubr.msk.f32.mxu1 %vm1698_vm0, %v1699_v1 }
 0x5fc   : > { %v940_v59 = vmax.f32 %v933_v58, 0.0 }
 0x5fe   : > { %1357 = vmatmul.mubr.msk.f32.gmra.mrb[8].mxu1 %vm365_vm2, %v940_v59 }
 0x6c9   : > { %v1025_v61 = vpop.f32.mrb[12].mxu0 }
 0x6ca   : > { %v1026_v62 = vadd.f32 %v1222_v60, %v1025_v61  ;;  %v1352_v63 = vpop.f32.mrb[13].mxu0 }
 0x6cc   : > { %v1039_v3 = vmax.f32 %v1026_v62, 0.0 }
 0x6cd   : > { %v1030_v4 = vpop.f32.mrb[6].mxu1 }
 0x6ce   : > { %v1031_v5 = vadd.f32 %v1222_v60, %v1030_v4  ;;  %v1355_v6 = vpop.f32.mrb[7].mxu1  ;;  %v1045_v7 = vmul.f32 %v1042_v2, %v1039_v3 }
 0x6d0   : > { %v1040_v9 = vmax.f32 %v1031_v5, 0.0  ;;  %v1049_v10 = vsel %vm1048_vm10, %v1045_v7, 0.0 }
 0x6d1   : > { %v1035_v11 = vpop.f32.mrb[8].mxu1  ;;  %1050 = vadd.xlane.f32.xlu1 %v1049_v10 }
 0x6d2   : > { %v1036_v1 = vadd.f32 %v1222_v60, %v1035_v11  ;;  %v1358_v12 = vpop.f32.mrb[9].mxu1  ;;  %v1046_v13 = vmul.f32 %v1043_v8, %v1040_v9 }
 0x6d4   : > { %v1041_v15 = vmax.f32 %v1036_v1, 0.0  ;;  %v1052_v16 = vsel %vm1048_vm10, %v1046_v13, 0.0 }
 0x6d5   : > { %1053 = vadd.xlane.f32.xlu0 %v1052_v16 }
 0x6d6   : > { %v1047_v17 = vmul.f32 %v1044_v14, %v1041_v15 }
 0x6d8   : > { %v1056_v18 = vsel %vm1055_vm11, %v1047_v17, 0.0 }
 0x6d9   : > { %1057 = vadd.xlane.f32.xlu0 %v1056_v18 }
 0x75e   : > { %v1051_v22 = vpop.xlane.xlu1 %1050 }
 0x75f   : > { %v1063_v25 = vmul.f32 %v1059_v21, %v1051_v22 }
 0x762   : > { %v1054_v20 = vpop.xlane.xlu0 %1053 }
 0x763   : > { %v1064_v23 = vmul.f32 %v1060_v19, %v1054_v20 }
 0x765   : > { %v1066_v28 = vadd.f32 %v1064_v23, %v1063_v25 }
 0x766   : > { %v1058_v26 = vpop.xlane.xlu0 %1057 }
 0x767   : > { %v1065_v27 = vmul.f32 %v1061_v24, %v1058_v26 }
 0x769   : > { %v1068_v29 = vsel %vm1067_vm12, %v1065_v27, 0.0 }
 0x76a   : > { %v1069_v30 = vadd.f32 %v1068_v29, %v1066_v28 }
 0x76c   : > { %v1070_v31 = vrot.slane %v1069_v30, 4 }
 0x76e   : > { %v1071_v32 = vadd.f32 %v1070_v31, %v1069_v30 }
 0x770   : > { %v1072_v33 = vrot.slane %v1071_v32, 2 }
 0x772   : > { %v1073_v34 = vadd.f32 %v1072_v33, %v1071_v32 }
 0x774   : > { %v1074_v35 = vrot.slane %v1073_v34, 1 }
 0x776   : > { %v1075_v37 = vadd.f32 %v1074_v35, %v1073_v34 }
 0x778   : > { %v1076_v38 = vadd.f32 %v1075_v37, %v1062_v36 }
 0x77a   : > { %1077 = vst [vmem:[%s274_s25] sm:$0x1] %v1076_v38 }
 0x77b   : > { %1624 = shalt.err (!%p1621_p6)
}
 0x77c   : > { %s1625_s11 = scalar_lea.hbm %s2015_s26, 16  ;;  %s1629_s10 = scalar_lea.hbm %s2062_s4, 64 }
 0x77d   : > { %p1626_p1 = scmp.ne.s32.totalorder %s2015_s26, %s1625_s11  ;;  %p1630_p10 = scmp.lt.u32.totalorder %s2015_s26, %s2062_s4 }
 0x77e   : > { %p1631_p8 = scmp.lt.u32.totalorder %s1629_s10, %s1625_s11  ;;  %p1633_p3 = scmp.lt.u32.totalorder %s1625_s11, %s2015_s26 }
 0x77f   : > { %p1627_p0 = pnand %p1626_p1, %p2080_p7 }
 0x780   : > { %p1632_p13 = por %p1631_p8, %p1630_p10 }
 0x781   : > { %p1628_p4 = pneg %p1627_p0 }
 0x782   : > { %p1634_p9 = por %p1633_p3, %p1632_p13 }
 0x784   : > { %p1635_p12 = pnand %p1634_p9, %p1628_p4 }
 0x786   : > { %1638 = shalt.err (!%p1635_p12)
}
 0x787   : > { %1415 = dma.vmem_to_hbm [thread:$0]  (%p2080_p7), %s2017_s8, 16, %s2015_s26, %s1079_s28  }
 0x788 PF: > { %p1440_p5 = scmp.ge.s32.totalorder %s1689_s18, 2  ;;  %s1103_s12 = sand.u32 1, %s1677_s15  }
 0x789   : > { %p2081_p11 = scmp.ne.s32.totalorder %s2068_s22, 0  ;;  %s1104_s30 = scalar_lea.sflag [#allocation4], %s1103_s12 }
 0x78b   : > { %p1432_p2 = pnand %p1440_p5, %p2081_p11 }
 0x78d   : > { %1672 = dma.done.wait (!%p1432_p2), %s1104_s30, 16  }
 0x78e   : > { %1674 = vsyncadd (!%p1432_p2), %s1104_s30, 4294967280  ;;  %p21_p6 = scmp.ge.s32.totalorder %s1832_s9, 6   ;;  %s2082_s15 = smov %s1681_s16 }
 0x78f   : > { %s2083_s16 = smov %s1685_s17  ;;  %s2084_s17 = smov %s1848_s14 }
 0x790   : > { %s2085_s18 = smov %s1832_s9  ;;  %23 = sbr.rel (!%p21_p6) target bundleno = 8 (0x8), region = 102 }
 0x797   :  { %1108 = vsyncpa [#allocation3], 1 }
 0x798   :  { %1110 = vsyncpa [#allocation3 + $0x1], 1 }
 0x799   :  { %1111 = vsyncpa [#allocation6], 1 }
 0x79a   :  { %1113 = vsyncpa [#allocation6 + $0x1], 1 }
 0x79b   :  { %1114 = vsyncpa [#allocation9], 1 }
 0x79c   :  { %1115 = vsyncpa [#allocation4], 1 }
 0x79d   :  { %1117 = vsyncpa [#allocation4 + $0x1], 1 }

</bundles_post_ra>
